<compile_context>
chip_gen: v6e
topology: v6e:2x2x1
jax: 0.10.0
libtpu: 0.0.40
codegen_flags: <defaults>
</compile_context>

<pallas_src>
import functools

import jax
import jax.numpy as jnp
import numpy as np
from jax.experimental import pallas as pl
from jax.experimental.pallas import tpu as pltpu


_LANE = 128
_SUBLANE = 8
_TARGET_BLOCK_BYTES = 2 << 20   # ~2 MiB per pipelined block
_MAX_TILE_ROWS = 512


def _copy_kernel(x_ref, o_ref):
    # Fast path: BlockSpec already selected only the kept rows/lanes.
    o_ref[...] = x_ref[...]


def _strided_kernel(x_ref, o_ref, *, scale):
    # Fallback: strided sublane select inside the tile.
    n_rows = o_ref.shape[0]
    o_ref[...] = x_ref[pl.ds(0, n_rows, stride=scale), :]


def _pick_tile(n_out, bytes_per_row):
    """Output-row tile: multiple of 8 (or the full extent), VMEM-friendly size."""
    rows = _TARGET_BLOCK_BYTES // max(int(bytes_per_row), 1)
    rows = max(_SUBLANE, min(_MAX_TILE_ROWS, (rows // _SUBLANE) * _SUBLANE))
    if rows >= n_out:
        return n_out            # full extent -> always a legal block shape
    return rows


def downsample(x, scale_factor=1):
    """Pallas equivalent of DownSample(scale_factor).forward(x) for x of shape (1, N, D)."""
    assert x.ndim == 3 and x.shape[0] == 1, "expected (1, N, D) input"
    scale = int(scale_factor)
    _, n, d = x.shape

    if scale == 1:
        # Pure identity: launching a kernel would just burn an HBM round-trip.
        return x

    n_out = -(-n // scale)                      # ceil(N / scale) == len(x[::scale])
    itemsize = jnp.dtype(x.dtype).itemsize

    x2 = x[0]                                   # squeeze(0)  (glue outside kernel)
    n_pad = n_out * scale
    if n_pad != n:
        # Pad so the group-regrouping is exact; padded rows are never read on the
        # fast path (they sit at positions >= 1 inside the last group) and are
        # discarded by the strided select on the fallback path.
        x2 = jnp.pad(x2, ((0, n_pad - n), (0, 0)))

    params = pltpu.CompilerParams(
        dimension_semantics=("parallel",),      # independent row tiles (2 TCs on v7x)
        vmem_limit_bytes=32 * 1024 * 1024,      # explicit, safe on v5e/v6e/v7x
    )

    if d % _LANE == 0:
        # ---- Fast path: stride folded into the BlockSpec / DMA -----------------
        # (n_pad, d) -> (n_out, scale*d): the kept row of each group is the first
        # d lanes of each grouped row; the DMA only fetches those lanes.
        xg = x2.reshape(n_out, scale * d)
        tile = _pick_tile(n_out, d * itemsize)
        grid = (pl.cdiv(n_out, tile),)
        out = pl.pallas_call(
            _copy_kernel,
            out_shape=jax.ShapeDtypeStruct((n_out, d), x.dtype),
            grid=grid,
            in_specs=[pl.BlockSpec((tile, d), lambda i: (i, 0))],
            out_specs=pl.BlockSpec((tile, d), lambda i: (i, 0)),
            compiler_params=params,
        )(xg)
    else:
        # ---- Fallback (ragged D): tiled strided sublane select ------------------
        tile = _pick_tile(n_out, scale * d * itemsize)
        grid = (pl.cdiv(n_out, tile),)
        kern = functools.partial(_strided_kernel, scale=scale)
        out = pl.pallas_call(
            kern,
            out_shape=jax.ShapeDtypeStruct((n_out, d), x.dtype),
            grid=grid,
            in_specs=[pl.BlockSpec((tile * scale, d), lambda i: (i, 0))],
            out_specs=pl.BlockSpec((tile, d), lambda i: (i, 0)),
            compiler_params=params,
        )(x2)

    return out[None]                            # unsqueeze(0)


if __name__ == "__main__":
    key = jax.random.PRNGKey(0)
    k1, k2 = jax.random.split(key)

    # Fast path: D multiple of 128, N divisible by scale.
    x1 = jax.random.normal(k1, (1, 16, 128), dtype=jnp.float32)
    y1 = jax.block_until_ready(downsample(x1, scale_factor=2))
    y1_ref = x1[0][::2][None]
    assert y1.shape == y1_ref.shape, (y1.shape, y1_ref.shape)
    np.testing.assert_allclose(np.asarray(y1), np.asarray(y1_ref), rtol=0, atol=0)

    # Fallback path: ragged D (not a multiple of 128) and N % scale != 0.
    x2 = jax.random.normal(k2, (1, 15, 64), dtype=jnp.float32)
    y2 = jax.block_until_ready(downsample(x2, scale_factor=4))
    y2_ref = x2[0][::4][None]
    assert y2.shape == y2_ref.shape, (y2.shape, y2_ref.shape)
    np.testing.assert_allclose(np.asarray(y2), np.asarray(y2_ref), rtol=0, atol=0)

    # scale_factor == 1 identity shortcut (no kernel launch).
    y3 = jax.block_until_ready(downsample(x1, scale_factor=1))
    np.testing.assert_allclose(np.asarray(y3), np.asarray(x1), rtol=0, atol=0)

    print("KERNEL_OK")
</pallas_src>

<mosaic_0001>
module attributes {stable_mosaic.version = 11 : i64} {
  func.func @_copy_kernel(%arg0: i32, %arg1: memref<8x128xf32, #tpu.memory_space<vmem>>, %arg2: memref<8x128xf32, #tpu.memory_space<vmem>>) attributes {dimension_semantics = [#tpu.dimension_semantics<parallel>], iteration_bounds = array<i64: 1>, scalar_prefetch = 0 : i64, scratch_operands = 0 : i64, tpu.core_type = #tpu.core_type<tc>, window_params = [{transform_indices = @transform_0, window_bounds = array<i64: 8, 128>}, {transform_indices = @transform_1, window_bounds = array<i64: 8, 128>}]} {
    %c0 = arith.constant 0 : index
    %c0_0 = arith.constant 0 : index
    %0 = vector.load %arg1[%c0, %c0_0] : memref<8x128xf32, #tpu.memory_space<vmem>>, vector<8x128xf32>
    %c0_1 = arith.constant 0 : index
    %c0_2 = arith.constant 0 : index
    %1 = vector.load %arg2[%c0_1, %c0_2] : memref<8x128xf32, #tpu.memory_space<vmem>>, vector<8x128xf32>
    tpu.vector_store %arg2[%c0_1, %c0_2], %0 {strides = array<i32>} : memref<8x128xf32, #tpu.memory_space<vmem>>, vector<8x128xf32>,
    return
  }
  func.func @transform_0(%arg0: i32) -> (i32, i32) {
    %c0_i32 = arith.constant 0 : i32
    %c0_i32_0 = arith.constant 0 : i32
    return %arg0, %c0_i32 : i32, i32
  }
  func.func @transform_1(%arg0: i32) -> (i32, i32) {
    %c0_i32 = arith.constant 0 : i32
    %c0_i32_0 = arith.constant 0 : i32
    return %arg0, %c0_i32 : i32, i32
  }
}

</mosaic_0001>

<bundles_post_ra>
// kernel: tpu_custom_call.1
= control target key start
LH: loop header
LB: loop body
LE: loop exit
PB: predicated region body
PF: predicated region fallthrough
CT: control target
= control target key end

     0   :  { %6 = vsyncpa [#allocation3], 0  ;;  %s102_s0 = inlined_call_operand.hbm [shape: f32[8,256], index: 0, kind: input, shape index: {}]   ;;  %s103_s1 = inlined_call_operand.hbm [shape: f32[8,128], index: 1, kind: output, shape index: {}]  }
   0x1   :  { %7 = vsyncpa [#allocation4], 0  ;;  %s84_s6 = smov [#allocation2]  }
   0x2   :  { %s14_s7 = sshll.u32 %s84_s6, 4  ;;  %s15_s7 = int_to_ptr.vmem [resolvable:$true] %s14_s7 }
   0x3   :  { %s48_s8 = scalar_lea.vmem %s15_s7, 128  ;;  %p53_p1 = scmp.lt.s32.totalorder %s15_s7, %s15_s7 }
   0x4   :  { %p49_p0 = scmp.ne.s32.totalorder %s15_s7, %s48_s8  ;;  %p54_p2 = scmp.lt.s32.totalorder %s48_s8, %s48_s8 }
   0x6   :  { %p55_p3 = por %p54_p2, %p53_p1 }
   0x8   :  { %p56_p4 = pnand %p55_p3, %p49_p0 }
   0xa   :  { %59 = shalt.err (!%p56_p4)
}
   0xb   :  { %17 = dma.hbm_to_vmem [thread:$0]  %s102_s0, 128, %s15_s7, [#allocation3]  }
   0xc   :  { %80 = dma.done.wait [#allocation3], 128  }
   0xd   :  { %81 = vsyncadd [#allocation3], 4294967168  ;;  %s85_s11 = smov [#allocation5]   ;;  %v21_v0 = vld [vmem:[#allocation2] sm:$0xff] }
   0xe   :  { %s29_s12 = sshll.u32 %s85_s11, 4  ;;  %22 = vst [vmem:[#allocation5] sm:$0xff] %v21_v0  ;;  %s30_s12 = int_to_ptr.vmem [resolvable:$true] %s29_s12 }
   0xf   :  { %s60_s13 = scalar_lea.vmem %s30_s12, 128  ;;  %p65_p6 = scmp.lt.s32.totalorder %s30_s12, %s30_s12 }
  0x10   :  { %p61_p5 = scmp.ne.s32.totalorder %s30_s12, %s60_s13  ;;  %p66_p7 = scmp.lt.s32.totalorder %s60_s13, %s60_s13 }
  0x12   :  { %p67_p8 = por %p66_p7, %p65_p6 }
  0x14   :  { %p68_p9 = pnand %p67_p8, %p61_p5 }
  0x16   :  { %71 = shalt.err (!%p68_p9)
}
  0x17   :  { %32 = dma.vmem_to_hbm [thread:$0]  %s30_s12, 128, %s103_s1, [#allocation4]  }
  0x18   :  { %82 = dma.done.wait [#allocation4], 128  }
  0x19   :  { %83 = vsyncadd [#allocation4], 4294967168 }
  0x1a   :  { %36 = vsyncpa [#allocation3], 1 }
  0x1b   :  { %37 = vsyncpa [#allocation4], 1 }

</bundles_post_ra>
